<compile_context>
chip_gen: v7x
topology: tpu7x:2x2x1
jax: 0.10.0
libtpu: 0.0.40
codegen_flags: <defaults>
</compile_context>

<pallas_src>
import functools
import math

import jax
import jax.numpy as jnp
from jax.experimental import pallas as pl
from jax.experimental.pallas import tpu as pltpu

MAX_ROW_TILE = 512      # rows per grid step


# ----------------------------------------------------------------------------
# small helpers
# ----------------------------------------------------------------------------
def _pick_vmem_limit():
    """~75% of physical VMEM: 96 MiB on v5e/v6e, 48 MiB on v7x."""
    try:
        cap = getattr(pltpu.get_tpu_info(), "vmem_capacity_bytes", None)
        if cap:
            return int(cap) * 3 // 4
    except Exception:
        pass
    return 48 * 1024 * 1024


_VMEM_LIMIT_BYTES = _pick_vmem_limit()


def _compiler_params(semantics):
    return pltpu.CompilerParams(dimension_semantics=tuple(semantics),
                                vmem_limit_bytes=_VMEM_LIMIT_BYTES)


def _round_up(x, m):
    return ((x + m - 1) // m) * m


def _sublane(dtype):
    return 16 if jnp.dtype(dtype).itemsize == 2 else 8


def _row_tile(m, dtype):
    """Row tile: multiple of the sublane packing (or the full extent), aiming
    for >=2 grid steps so 'parallel' axes can shard across v7x's 2 TCs."""
    mult = _sublane(dtype)
    if m <= mult:
        return m                      # block == full dim is always legal
    target = _round_up(max(m // 2, mult), mult)
    return min(target, MAX_ROW_TILE)


def _col_tile(n, max_tile=2048):
    """Output-column tile (full when small, else a 128-multiple tile)."""
    return n if n <= max_tile else max_tile


def _reduction_tile(n, max_tile=1024):
    """K tile for the FFN hidden dim; must divide n exactly (a ragged block on
    a reduction axis would accumulate out-of-bounds garbage)."""
    if n <= max_tile:
        return n
    for t in (max_tile, 512, 256, 128):
        if n % t == 0:
            return t
    return n


# ----------------------------------------------------------------------------
# Linear:  y = x @ W (+ b)       (weights stored (in, out), pre-cast)
# ----------------------------------------------------------------------------
def _linear_kernel(x_ref, w_ref, o_ref):
    y = jnp.dot(x_ref[...], w_ref[...], preferred_element_type=jnp.float32)
    o_ref[...] = y.astype(o_ref.dtype)


def _linear_bias_kernel(x_ref, w_ref, b_ref, o_ref):
    y = jnp.dot(x_ref[...], w_ref[...], preferred_element_type=jnp.float32)
    o_ref[...] = (y + b_ref[...]).astype(o_ref.dtype)


def linear(x, w, b=None, *, out_dtype=None):
    """x: (..., d_in); w: (d_in, d_out) already in compute dtype; b: (1, d_out) f32."""
    d_in, d_out = w.shape
    orig = x.shape
    x2 = x.reshape(-1, d_in)
    if x2.dtype != w.dtype:
        x2 = x2.astype(w.dtype)
    m = x2.shape[0]
    out_dtype = w.dtype if out_dtype is None else out_dtype
    tm = _row_tile(m, x2.dtype)
    tn = _col_tile(d_out)
    grid = (pl.cdiv(m, tm), pl.cdiv(d_out, tn))

    if b is None:
        kernel = _linear_kernel
        in_specs = [
            pl.BlockSpec((tm, d_in), lambda i, j: (i, 0)),
            pl.BlockSpec((d_in, tn), lambda i, j: (0, j)),
        ]
        args = (x2, w)
    else:
        kernel = _linear_bias_kernel
        in_specs = [
            pl.BlockSpec((tm, d_in), lambda i, j: (i, 0)),
            pl.BlockSpec((d_in, tn), lambda i, j: (0, j)),
            pl.BlockSpec((1, tn), lambda i, j: (0, j)),
        ]
        args = (x2, w, b)

    out = pl.pallas_call(
        kernel,
        out_shape=jax.ShapeDtypeStruct((m, d_out), out_dtype),
        grid_spec=pltpu.PrefetchScalarGridSpec(
            num_scalar_prefetch=0, grid=grid,
            in_specs=in_specs,
            out_specs=pl.BlockSpec((tm, tn), lambda i, j: (i, j)),
        ),
        compiler_params=_compiler_params(("parallel", "parallel")),
    )(*args)
    return out.reshape(*orig[:-1], d_out)


# ----------------------------------------------------------------------------
# Linear + AddNorm epilogue:  LayerNorm(residual + x @ W)   (W_o projection)
# ----------------------------------------------------------------------------
def _linear_addnorm_kernel(x_ref, w_ref, r_ref, g_ref, b_ref, o_ref, *, eps):
    y = jnp.dot(x_ref[...], w_ref[...], preferred_element_type=jnp.float32)
    s = y + r_ref[...].astype(jnp.float32)
    mu = jnp.mean(s, axis=-1, keepdims=True)
    c = s - mu
    var = jnp.mean(c * c, axis=-1, keepdims=True)
    inv = jax.lax.rsqrt(var + eps)
    o_ref[...] = (c * inv * g_ref[...] + b_ref[...]).astype(o_ref.dtype)


def linear_add_norm(x, w, residual, gamma, beta, *, eps=1e-5, out_dtype=None):
    d_in, d_out = w.shape
    orig = residual.shape
    x2 = x.reshape(-1, d_in)
    r2 = residual.reshape(-1, d_out)
    if x2.dtype != w.dtype:
        x2 = x2.astype(w.dtype)
    m = x2.shape[0]
    out_dtype = w.dtype if out_dtype is None else out_dtype
    tm = _row_tile(m, x2.dtype)
    grid = (pl.cdiv(m, tm),)

    out = pl.pallas_call(
        functools.partial(_linear_addnorm_kernel, eps=eps),
        out_shape=jax.ShapeDtypeStruct((m, d_out), out_dtype),
        grid_spec=pltpu.PrefetchScalarGridSpec(
            num_scalar_prefetch=0, grid=grid,
            in_specs=[
                pl.BlockSpec((tm, d_in), lambda i: (i, 0)),
                pl.BlockSpec((d_in, d_out), lambda i: (0, 0)),
                pl.BlockSpec((tm, d_out), lambda i: (i, 0)),
                pl.BlockSpec((1, d_out), lambda i: (0, 0)),
                pl.BlockSpec((1, d_out), lambda i: (0, 0)),
            ],
            out_specs=pl.BlockSpec((tm, d_out), lambda i: (i, 0)),
        ),
        compiler_params=_compiler_params(("parallel",)),
    )(x2, w, r2, gamma, beta)
    return out.reshape(orig)


# ----------------------------------------------------------------------------
# Fused PositionWiseFFN + AddNorm:
#   LayerNorm(x + relu(x@W1 + b1) @ W2 + b2), K-tiled over ffn_num_hiddens
# ----------------------------------------------------------------------------
def _ffn_addnorm_kernel(x_ref, w1_ref, b1_ref, w2_ref, b2_ref, g_ref, bln_ref,
                        o_ref, acc_ref, *, eps):
    k = pl.program_id(1)

    @pl.when(k == 0)
    def _():
        acc_ref[...] = jnp.zeros_like(acc_ref)

    h = jnp.dot(x_ref[...], w1_ref[...], preferred_element_type=jnp.float32)
    h = jnp.maximum(h + b1_ref[...], 0.0)
    acc_ref[...] += jnp.dot(h.astype(w2_ref.dtype), w2_ref[...],
                            preferred_element_type=jnp.float32)

    @pl.when(k == pl.num_programs(1) - 1)
    def _():
        s = acc_ref[...] + b2_ref[...] + x_ref[...].astype(jnp.float32)
        mu = jnp.mean(s, axis=-1, keepdims=True)
        c = s - mu
        var = jnp.mean(c * c, axis=-1, keepdims=True)
        inv = jax.lax.rsqrt(var + eps)
        o_ref[...] = (c * inv * g_ref[...] + bln_ref[...]).astype(o_ref.dtype)


def ffn_add_norm(x, w1, b1, w2, b2, gamma, beta, *, eps=1e-5, out_dtype=None):
    orig = x.shape
    d = orig[-1]
    d_hid = w1.shape[1]
    x2 = x.reshape(-1, d)
    if x2.dtype != w1.dtype:
        x2 = x2.astype(w1.dtype)
    m = x2.shape[0]
    out_dtype = w1.dtype if out_dtype is None else out_dtype
    tm = _row_tile(m, x2.dtype)
    tk = _reduction_tile(d_hid)
    grid = (pl.cdiv(m, tm), d_hid // tk)

    out = pl.pallas_call(
        functools.partial(_ffn_addnorm_kernel, eps=eps),
        out_shape=jax.ShapeDtypeStruct((m, d), out_dtype),
        grid_spec=pltpu.PrefetchScalarGridSpec(
            num_scalar_prefetch=0, grid=grid,
            in_specs=[
                pl.BlockSpec((tm, d), lambda i, k: (i, 0)),
                pl.BlockSpec((d, tk), lambda i, k: (0, k)),
                pl.BlockSpec((1, tk), lambda i, k: (0, k)),
                pl.BlockSpec((tk, d), lambda i, k: (k, 0)),
                pl.BlockSpec((1, d), lambda i, k: (0, 0)),
                pl.BlockSpec((1, d), lambda i, k: (0, 0)),
                pl.BlockSpec((1, d), lambda i, k: (0, 0)),
            ],
            out_specs=pl.BlockSpec((tm, d), lambda i, k: (i, 0)),
            scratch_shapes=[pltpu.VMEM((tm, d), jnp.float32)],
        ),
        compiler_params=_compiler_params(("parallel", "arbitrary")),
    )(x2, w1, b1, w2, b2, gamma, beta)
    return out.reshape(orig)


# ----------------------------------------------------------------------------
# Masked scaled-dot-product attention (d2l DotProductAttention semantics)
# ----------------------------------------------------------------------------
def _attention_kernel(q_ref, k_ref, v_ref, vl_ref, o_ref, *, scale):
    q = q_ref[0]                                             # (tq, dh)
    k = k_ref[0]                                             # (sk, dh)
    v = v_ref[0]                                             # (sk, dh)
    s = jax.lax.dot_general(q, k, (((1,), (1,)), ((), ())),
                            preferred_element_type=jnp.float32) * scale
    kpos = jax.lax.broadcasted_iota(jnp.int32, s.shape, 1)
    s = jnp.where(kpos < vl_ref[0], s, -1e6)                 # masked softmax
    mx = jnp.max(s, axis=-1, keepdims=True)
    p = jnp.exp(s - mx)
    p = p * pl.reciprocal(jnp.sum(p, axis=-1, keepdims=True), approx=True)
    o = jnp.dot(p.astype(v.dtype), v, preferred_element_type=jnp.float32)
    o_ref[0] = o.astype(o_ref.dtype)


def masked_attention(q, k, v, valid_lens, *, out_dtype=None):
    """q: (BH, Sq, dh), k/v: (BH, Sk, dh), valid_lens: (BH, Sq) int32 or None."""
    bh, sq, dh = q.shape
    sk = k.shape[1]
    out_dtype = q.dtype if out_dtype is None else out_dtype
    if valid_lens is None:
        vl = jnp.full((bh, sq, 1), sk, jnp.int32)
    else:
        vl = valid_lens.astype(jnp.int32).reshape(bh, sq, 1)
    tq = _row_tile(sq, q.dtype)
    grid = (bh, pl.cdiv(sq, tq))

    return pl.pallas_call(
        functools.partial(_attention_kernel, scale=1.0 / math.sqrt(dh)),
        out_shape=jax.ShapeDtypeStruct((bh, sq, dh), out_dtype),
        grid_spec=pltpu.PrefetchScalarGridSpec(
            num_scalar_prefetch=0, grid=grid,
            in_specs=[
                pl.BlockSpec((1, tq, dh), lambda b, qi: (b, qi, 0)),
                pl.BlockSpec((1, sk, dh), lambda b, qi: (b, 0, 0)),
                pl.BlockSpec((1, sk, dh), lambda b, qi: (b, 0, 0)),
                pl.BlockSpec((1, tq, 1), lambda b, qi: (b, qi, 0)),
            ],
            out_specs=pl.BlockSpec((1, tq, dh), lambda b, qi: (b, qi, 0)),
        ),
        compiler_params=_compiler_params(("parallel", "parallel")),
    )(q, k, v, vl)


# ----------------------------------------------------------------------------
# Positional encoding:  X * sqrt(D) + P[:, :S, :]     (dropout == identity)
# ----------------------------------------------------------------------------
def _pos_encode_kernel(x_ref, p_ref, o_ref, *, scale):
    o_ref[...] = (x_ref[...].astype(jnp.float32) * scale
                  + p_ref[...]).astype(o_ref.dtype)


def positional_encoding(x, pos_table, scale, *, out_dtype):
    b, s, d = x.shape
    p = pos_table[:, :s, :]
    return pl.pallas_call(
        functools.partial(_pos_encode_kernel, scale=float(scale)),
        out_shape=jax.ShapeDtypeStruct((b, s, d), out_dtype),
        grid_spec=pltpu.PrefetchScalarGridSpec(
            num_scalar_prefetch=0, grid=(b,),
            in_specs=[
                pl.BlockSpec((1, s, d), lambda i: (i, 0, 0)),
                pl.BlockSpec((1, s, d), lambda i: (0, 0, 0)),
            ],
            out_specs=pl.BlockSpec((1, s, d), lambda i: (i, 0, 0)),
        ),
        compiler_params=_compiler_params(("parallel",)),
    )(x, p)


# ----------------------------------------------------------------------------
# head split / merge (XLA-level plumbing)
# ----------------------------------------------------------------------------
def _split_heads(x, num_heads, num_groups):
    """(B, S, G*D) -> (G, B*H, S, dh) with a single packed transpose."""
    b, s, gd = x.shape
    d = gd // num_groups
    dh = d // num_heads
    x = x.reshape(b, s, num_groups, num_heads, dh)
    x = jnp.transpose(x, (2, 0, 3, 1, 4))
    return x.reshape(num_groups, b * num_heads, s, dh)


def _merge_heads(x, num_heads):
    bh, s, dh = x.shape
    b = bh // num_heads
    x = x.reshape(b, num_heads, s, dh)
    x = jnp.transpose(x, (0, 2, 1, 3))
    return x.reshape(b, s, num_heads * dh)


def _expand_valid(valid_lens, b, sq, num_heads):
    """d2l valid_lens ((B,) or (B,Sq)) -> per-(batch*head, query) lengths."""
    if valid_lens is None:
        return None
    vl = jnp.asarray(valid_lens, jnp.int32)
    if vl.ndim == 1:
        vl = jnp.broadcast_to(vl[:, None], (b, sq))
    return jnp.repeat(vl, num_heads, axis=0)   # == torch.repeat_interleave


# ----------------------------------------------------------------------------
# Decoder block / full decoder
# ----------------------------------------------------------------------------
def decoder_block_forward(x, enc_outputs, enc_valid_lens, cache, p, *,
                          num_heads, training):
    b, s, d = x.shape
    h = num_heads
    key_values = x if cache is None else jnp.concatenate([cache, x], axis=1)
    if training:
        dec_valid = jnp.broadcast_to(
            jnp.arange(1, s + 1, dtype=jnp.int32)[None, :], (b, s))
    else:
        dec_valid = None

    # --- masked self-attention ------------------------------------------------
    if cache is None:
        qkv = _split_heads(linear(x, p['Wqkv1']), h, 3)        # fused QKV matmul
        attn1 = masked_attention(qkv[0], qkv[1], qkv[2],
                                 _expand_valid(dec_valid, b, s, h))
    else:
        # TODO(synk): decode path re-projects the whole prefix each step; cache
        # projected per-head K/V with input_output_aliases for O(1)/token decode.
        q1 = _split_heads(linear(x, p['Wqkv1'][:, :d]), h, 1)[0]
        kv1 = _split_heads(linear(key_values, p['Wqkv1'][:, d:]), h, 2)
        attn1 = masked_attention(q1, kv1[0], kv1[1],
                                 _expand_valid(dec_valid, b, s, h))
    attn1 = _merge_heads(attn1, h)
    y = linear_add_norm(attn1, p['Wo1'], x, p['ln1_g'], p['ln1_b'])

    # --- cross-attention on encoder outputs ------------------------------------
    q2 = _split_heads(linear(y, p['Wq2']), h, 1)[0]
    kv2 = _split_heads(linear(enc_outputs, p['Wkv2']), h, 2)   # fused K|V matmul
    attn2 = masked_attention(q2, kv2[0], kv2[1],
                             _expand_valid(enc_valid_lens, b, s, h))
    attn2 = _merge_heads(attn2, h)
    z = linear_add_norm(attn2, p['Wo2'], y, p['ln2_g'], p['ln2_b'])

    # --- position-wise FFN (AddNorm fused) --------------------------------------
    out = ffn_add_norm(z, p['ffn_w1'], p['ffn_b1'], p['ffn_w2'], p['ffn_b2'],
                       p['ln3_g'], p['ln3_b'])
    return out, key_values


def init_state(enc_outputs, enc_valid_lens, num_layers):
    return [enc_outputs, enc_valid_lens, [None] * num_layers]


def transformer_decoder_forward(tokens, state, fast_params, *, num_heads,
                                training=True):
    enc_outputs, enc_valid_lens, caches = state
    cd = fast_params['compute_dtype']
    d = fast_params['embedding'].shape[1]
    # TODO(synk): embedding gather is data-dependent (not a rectangular
    # BlockSpec window); left to XLA.
    emb = jnp.take(fast_params['embedding'], tokens, axis=0)
    x = positional_encoding(emb, fast_params['pos_P'], math.sqrt(d),
                            out_dtype=cd)
    enc_c = enc_outputs.astype(cd)
    new_caches = []
    for i, blk in enumerate(fast_params['blocks']):
        x, kv = decoder_block_forward(x, enc_c, enc_valid_lens, caches[i], blk,
                                      num_heads=num_heads, training=training)
        new_caches.append(kv)
    # TODO(synk): per-layer attention-weight recording (d2l bookkeeping) omitted.
    logits = linear(x, fast_params['W_out'], fast_params['b_out'],
                    out_dtype=jnp.float32)
    return logits, [enc_outputs, enc_valid_lens, new_caches]


# ----------------------------------------------------------------------------
# Parameters (PyTorch-like f32 master copy + pre-cast/fused kernel params)
# ----------------------------------------------------------------------------
def _make_positional_encoding(max_len, num_hiddens):
    pos = jnp.arange(max_len, dtype=jnp.float32)[:, None]
    div = jnp.power(10000.0, jnp.arange(0, num_hiddens, 2,
                                        dtype=jnp.float32) / num_hiddens)
    ang = pos / div
    p = jnp.zeros((1, max_len, num_hiddens), jnp.float32)
    p = p.at[0, :, 0::2].set(jnp.sin(ang))
    p = p.at[0, :, 1::2].set(jnp.cos(ang))
    return p


def init_params(key, *, vocab_size, num_hiddens, ffn_num_hiddens, num_layers,
                max_len=1000):
    n_rand = 3 + 12 * num_layers
    kit = iter(jax.random.split(key, n_rand))

    def nrm(shape, scale=0.1):
        return jax.random.normal(next(kit), shape, jnp.float32) * scale

    params = {
        'embedding': nrm((vocab_size, num_hiddens), 1.0),
        'pos_P': _make_positional_encoding(max_len, num_hiddens),
        'W_out': nrm((num_hiddens, vocab_size)),
        'b_out': nrm((vocab_size,)),
        'blocks': [],
    }
    for _ in range(num_layers):
        blk = {}
        for name in ('Wq1', 'Wk1', 'Wv1', 'Wo1', 'Wq2', 'Wk2', 'Wv2', 'Wo2'):
            blk[name] = nrm((num_hiddens, num_hiddens))
        blk['ffn_w1'] = nrm((num_hiddens, ffn_num_hiddens))
        blk['ffn_b1'] = nrm((ffn_num_hiddens,))
        blk['ffn_w2'] = nrm((ffn_num_hiddens, num_hiddens))
        blk['ffn_b2'] = nrm((num_hiddens,))
        for j in (1, 2, 3):
            blk[f'ln{j}_g'] = jnp.ones((num_hiddens,), jnp.float32)
            blk[f'ln{j}_b'] = jnp.zeros((num_hiddens,), jnp.float32)
        params['blocks'].append(blk)
    return params


def prepare_fast_params(params, compute_dtype=jnp.bfloat16):
    """One-time fuse + cast of the weights into the kernel-ready layout."""
    cd = compute_dtype
    fp = {
        'compute_dtype': cd,
        'embedding': params['embedding'],                       # f32 (gathered)
        'pos_P': params['pos_P'],                               # f32
        'W_out': params['W_out'].astype(cd),
        'b_out': params['b_out'].reshape(1, -1).astype(jnp.float32),
        'blocks': [],
    }
    for blk in params['blocks']:
        fb = {
            'Wqkv1': jnp.concatenate([blk['Wq1'], blk['Wk1'], blk['Wv1']],
                                     axis=1).astype(cd),
            'Wo1': blk['Wo1'].astype(cd),
            'Wq2': blk['Wq2'].astype(cd),
            'Wkv2': jnp.concatenate([blk['Wk2'], blk['Wv2']],
                                    axis=1).astype(cd),
            'Wo2': blk['Wo2'].astype(cd),
            'ffn_w1': blk['ffn_w1'].astype(cd),
            'ffn_b1': blk['ffn_b1'].reshape(1, -1).astype(jnp.float32),
            'ffn_w2': blk['ffn_w2'].astype(cd),
            'ffn_b2': blk['ffn_b2'].reshape(1, -1).astype(jnp.float32),
        }
        for j in (1, 2, 3):
            fb[f'ln{j}_g'] = blk[f'ln{j}_g'].reshape(1, -1).astype(jnp.float32)
            fb[f'ln{j}_b'] = blk[f'ln{j}_b'].reshape(1, -1).astype(jnp.float32)
        fp['blocks'].append(fb)
    return fp


# ----------------------------------------------------------------------------
# Pure-JAX reference (run under 'highest' matmul precision)
# ----------------------------------------------------------------------------
def _ref_mha(q, k, v, valid_lens, wq, wk, wv, wo, num_heads):
    b, sq, _ = q.shape
    sk = k.shape[1]
    qh = _split_heads(q @ wq, num_heads, 1)[0]
    kh = _split_heads(k @ wk, num_heads, 1)[0]
    vh = _split_heads(v @ wv, num_heads, 1)[0]
    dh = qh.shape[-1]
    scores = jnp.einsum('bqd,bkd->bqk', qh, kh) / math.sqrt(dh)
    if valid_lens is None:
        valid = jnp.full((b * num_heads, sq), sk, jnp.int32)
    else:
        vl = jnp.asarray(valid_lens, jnp.int32)
        if vl.ndim == 1:
            vl = jnp.broadcast_to(vl[:, None], (b, sq))
        valid = jnp.repeat(vl, num_heads, axis=0)
    kpos = jnp.arange(sk)[None, None, :]
    scores = jnp.where(kpos < valid[:, :, None], scores, -1e6)
    probs = jax.nn.softmax(scores, axis=-1)
    o = jnp.einsum('bqk,bkd->bqd', probs, vh)
    return _merge_heads(o, num_heads) @ wo


def _ref_addnorm(x, y, g, b, eps=1e-5):
    s = x + y
    mu = s.mean(axis=-1, keepdims=True)
    var = ((s - mu) ** 2).mean(axis=-1, keepdims=True)
    return (s - mu) / jnp.sqrt(var + eps) * g + b


def _ref_decoder(tokens, enc_outputs, enc_valid_lens, params, *, num_heads,
                 training=True):
    d = params['embedding'].shape[1]
    s = tokens.shape[1]
    x = params['embedding'][tokens] * math.sqrt(d) + params['pos_P'][:, :s, :]
    for p in params['blocks']:
        b = x.shape[0]
        dec_valid = (jnp.broadcast_to(jnp.arange(1, s + 1)[None, :], (b, s))
                     if training else None)
        x2 = _ref_mha(x, x, x, dec_valid, p['Wq1'], p['Wk1'], p['Wv1'],
                      p['Wo1'], num_heads)
        y = _ref_addnorm(x, x2, p['ln1_g'], p['ln1_b'])
        y2 = _ref_mha(y, enc_outputs, enc_outputs, enc_valid_lens, p['Wq2'],
                      p['Wk2'], p['Wv2'], p['Wo2'], num_heads)
        z = _ref_addnorm(y, y2, p['ln2_g'], p['ln2_b'])
        f = (jnp.maximum(z @ p['ffn_w1'] + p['ffn_b1'], 0.0) @ p['ffn_w2']
             + p['ffn_b2'])
        x = _ref_addnorm(z, f, p['ln3_g'], p['ln3_b'])
    return x @ params['W_out'] + params['b_out']


# ----------------------------------------------------------------------------
# Demo
# ----------------------------------------------------------------------------
if __name__ == "__main__":
    batch, seq = 2, 8
    enc_seq = 8
    vocab_size = 40
    num_hiddens = 32
    num_heads = 4
    ffn_num_hiddens = 64
    num_layers = 2

    root = jax.random.PRNGKey(0)
    kp, kt, ke = jax.random.split(root, 3)
    params = init_params(kp, vocab_size=vocab_size, num_hiddens=num_hiddens,
                         ffn_num_hiddens=ffn_num_hiddens,
                         num_layers=num_layers, max_len=64)
    tokens = jax.random.randint(kt, (batch, seq), 0, vocab_size)
    enc_outputs = jax.random.normal(ke, (batch, enc_seq, num_hiddens),
                                    jnp.float32)
    enc_valid_lens = jnp.array([6, 8], dtype=jnp.int32)

    with jax.default_matmul_precision('highest'):
        ref = _ref_decoder(tokens, enc_outputs, enc_valid_lens, params,
                           num_heads=num_heads, training=True)
        ref = jax.block_until_ready(ref)

    def rel_err(a, b):
        a = a.astype(jnp.float32)
        b = b.astype(jnp.float32)
        return float(jnp.linalg.norm(a - b) / (jnp.linalg.norm(b) + 1e-9))

    # Production config: bf16 MXU operands + bf16 activations, f32 accumulation.
    fast_bf16 = prepare_fast_params(params, jnp.bfloat16)
    state = init_state(enc_outputs, enc_valid_lens, num_layers)
    logits, state = transformer_decoder_forward(
        tokens, state, fast_bf16, num_heads=num_heads, training=True)
    logits = jax.block_until_ready(logits)
    assert logits.shape == (batch, seq, vocab_size)
    assert bool(jnp.all(jnp.isfinite(logits)))
    assert state[2][0].shape == (batch, seq, num_hiddens)
    e_bf16 = rel_err(logits, ref)
    assert e_bf16 < 0.12, f"bf16 relative error too large: {e_bf16}"

    # f32 path: tighter check of the kernel math itself.
    fast_f32 = prepare_fast_params(params, jnp.float32)
    logits32, _ = transformer_decoder_forward(
        tokens, init_state(enc_outputs, enc_valid_lens, num_layers), fast_f32,
        num_heads=num_heads, training=True)
    logits32 = jax.block_until_ready(logits32)
    e_f32 = rel_err(logits32, ref)
    assert e_f32 < 0.05, f"f32 relative error too large: {e_f32}"

    print("KERNEL_OK")
</pallas_src>

<mosaic_0001>
module attributes {stable_mosaic.version = 11 : i64} {
  func.func @_pos_encode_kernel(%arg0: i32, %arg1: memref<1x8x32xf32, #tpu.memory_space<vmem>>, %arg2: memref<1x8x32xf32, #tpu.memory_space<vmem>>, %arg3: memref<1x8x32xbf16, #tpu.memory_space<vmem>>) attributes {dimension_semantics = [#tpu.dimension_semantics<parallel>], iteration_bounds = array<i64: 2>, scalar_prefetch = 0 : i64, scratch_operands = 0 : i64, tpu.core_type = #tpu.core_type<tc>, window_params = [{transform_indices = @transform_0, window_bounds = array<i64: 1, 8, 32>}, {pipeline_mode = #tpu.pipeline_mode<synchronous>, transform_indices = @transform_1, window_bounds = array<i64: 1, 8, 32>}, {transform_indices = @transform_2, window_bounds = array<i64: 1, 8, 32>}]} {
    %c0 = arith.constant 0 : index
    %c0_0 = arith.constant 0 : index
    %c0_1 = arith.constant 0 : index
    %0 = vector.load %arg1[%c0, %c0_0, %c0_1] : memref<1x8x32xf32, #tpu.memory_space<vmem>>, vector<1x8x32xf32>
    %cst = arith.constant 5.65685415 : f32
    %1 = vector.broadcast %cst : f32 to vector<1x8x32xf32>
    %2 = arith.mulf %0, %1 : vector<1x8x32xf32>
    %c0_2 = arith.constant 0 : index
    %c0_3 = arith.constant 0 : index
    %c0_4 = arith.constant 0 : index
    %3 = vector.load %arg2[%c0_2, %c0_3, %c0_4] : memref<1x8x32xf32, #tpu.memory_space<vmem>>, vector<1x8x32xf32>
    %4 = arith.addf %2, %3 : vector<1x8x32xf32>
    %5 = arith.truncf %4 : vector<1x8x32xf32> to vector<1x8x32xbf16>
    %c0_5 = arith.constant 0 : index
    %c0_6 = arith.constant 0 : index
    %c0_7 = arith.constant 0 : index
    %6 = vector.load %arg3[%c0_5, %c0_6, %c0_7] : memref<1x8x32xbf16, #tpu.memory_space<vmem>>, vector<1x8x32xbf16>
    tpu.vector_store %arg3[%c0_5, %c0_6, %c0_7], %5 {strides = array<i32>} : memref<1x8x32xbf16, #tpu.memory_space<vmem>>, vector<1x8x32xbf16>,
    return
  }
  func.func @transform_0(%arg0: i32) -> (i32, i32, i32) {
    %c0_i32 = arith.constant 0 : i32
    %c0_i32_0 = arith.constant 0 : i32
    %c0_i32_1 = arith.constant 0 : i32
    return %arg0, %c0_i32, %c0_i32_0 : i32, i32, i32
  }
  func.func @transform_1(%arg0: i32) -> (i32, i32, i32) {
    %c0_i32 = arith.constant 0 : i32
    %c0_i32_0 = arith.constant 0 : i32
    %c0_i32_1 = arith.constant 0 : i32
    %c0_i32_2 = arith.constant 0 : i32
    return %c0_i32, %c0_i32_0, %c0_i32_1 : i32, i32, i32
  }
  func.func @transform_2(%arg0: i32) -> (i32, i32, i32) {
    %c0_i32 = arith.constant 0 : i32
    %c0_i32_0 = arith.constant 0 : i32
    %c0_i32_1 = arith.constant 0 : i32
    return %arg0, %c0_i32, %c0_i32_0 : i32, i32, i32
  }
}

</mosaic_0001>

<bundles_post_ra>
// kernel: tpu_custom_call.1
= control target key start
LH: loop header
LB: loop body
LE: loop exit
PB: predicated region body
PF: predicated region fallthrough
CT: control target
= control target key end

     0   :  { %7 = vsyncpa [#allocation3], 0  ;;  %s694_s0 = inlined_call_operand.hbm [shape: f32[2,8,32], index: 0, kind: input, shape index: {}]   ;;  %s695_s1 = inlined_call_operand.hbm [shape: f32[1,8,32], index: 1, kind: input, shape index: {}]   ;;  %s696_s2 = inlined_call_operand.hbm [shape: bf16[2,8,32], index: 2, kind: output, shape index: {}]  }
   0x1   :  { %9 = vsyncpa [#allocation3 + $0x1], 0 }
   0x2   :  { %10 = vsyncpa [#allocation6], 0 }
   0x3   :  { %11 = vsyncpa [#allocation4], 0 }
   0x4   :  { %13 = vsyncpa [#allocation4 + $0x1], 0  ;;  %s492_s9 = smov 0   ;;  %s494_s10 = smov 0  }
   0x5   :  { %s496_s11 = smov 0   ;;  %s498_s12 = smov 0  }
   0x6 LB: > { %s513_s13 = sadd.s32 4294967295, %s472_s12   ;;  %s273_s14 = sadd.s32 4294967294, %s472_s12   ;;  %s472_s12 = sphi %s498_s12, %s720_s12   ;;  %s468_s11 = sphi %s496_s11, %s719_s11   ;;  %s464_s10 = sphi %s494_s10, %s718_s10   ;;  %s460_s9 = sphi %s492_s9, %s717_s9  }
   0x7   : > { %p39_p0 = scmp.ne.s32.totalorder %s464_s10, %s460_s9  ;;  %p697_p1 = scmp.eq.s32.totalorder %s513_s13, 0 }
   0x8   : > { %p90_p3 = scmp.eq.s32.totalorder %s273_s14, 1  ;;  %p274_p5 = scmp.ge.s32.totalorder %s472_s12, 1 }
   0x9   : > { %p522_p4 = por %p697_p1, %p39_p0  ;;  %p97_p7 = scmp.lt.s32.totalorder %s472_s12, 3 }
   0xa   : > { %p527_p6 = por %p90_p3, %p39_p0  ;;  %s474_s18 = smov [#allocation5]  }
   0xb   : > { %s700_s15 = scalar_select %p522_p4, 1, 0 }
   0xc   : > { %s701_s16 = scalar_select %p527_p6, 1, 0 }
   0xd   : > { %p532_p8 = pnand %p274_p5, %p97_p7  ;;  %s110_s19 = sshll.u32 %s474_s18, 4  ;;  %s111_s19 = int_to_ptr.vmem [resolvable:$true] %s110_s19 }
   0xe   : > { %s540_s20 = sadd.s32 1, %s472_s12   ;;  %s26_s24 = sadd.s32 1, %s468_s11 }
   0xf   : > { %s702_s17 = scalar_select %p532_p8, 1, 0 }
  0x10   : > { %p295_p10 = pneg %p532_p8  ;;  %s23_s22 = ssub.s32 %s472_s12, %s540_s20 }
  0x11   : > { %p550_p12 = scmp.eq.s32.totalorder %s23_s22, 0  ;;  %s344_s27 = scalar_lea.hbm %s695_s1, 128 }
  0x12   : > { %p544_p11 = pnand %p295_p10, %p697_p1  ;;  %p345_p0 = scmp.ne.s32.totalorder %s695_s1, %s344_s27 }
  0x13   : > { %s704_s23 = scalar_select %p550_p12, 1, 0 }
  0x14   : > { %p346_p3 = pneg %p544_p11  ;;  %p351_p10 = scmp.lt.u32.totalorder %s344_s27, %s695_s1 }
  0x16   : > { %p347_p5 = pnand %p346_p3, %p345_p0 }
  0x18   : > { %p348_p7 = pneg %p347_p5 }
  0x1a   : > { %p353_p9 = pnand %p351_p10, %p348_p7 }
  0x1c   : > { %356 = shalt.err (!%p353_p9)
}
  0x1d   : > { %s357_s4 = scalar_lea.vmem %s111_s19, 128  ;;  %p365_p6 = scmp.lt.s32.totalorder %s111_s19, %s111_s19 }
  0x1e   : > { %p358_p1 = scmp.ne.s32.totalorder %s111_s19, %s357_s4  ;;  %p366_p4 = scmp.lt.s32.totalorder %s357_s4, %s357_s4 }
  0x20   : > { %p360_p2 = pnand %p358_p1, %p346_p3  ;;  %p367_p8 = por %p366_p4, %p365_p6 }
  0x22   : > { %p361_p13 = pneg %p360_p2 }
  0x24   : > { %p368_p12 = pnand %p367_p8, %p361_p13 }
  0x26   : > { %371 = shalt.err (!%p368_p12)
}
  0x27   : > { %298 = dma.hbm_to_vmem [thread:$0]  (!%p544_p11), %s695_s1, 128, %s111_s19, [#allocation6]  }
  0x28   : > { %p705_p1 = scmp.ne.s32.totalorder %s704_s23, 0  ;;  %p34_p2 = scmp.eq.s32.totalorder %s472_s12, 0 }
  0x29   : > { %p706_p4 = scmp.ne.s32.totalorder %s468_s11, %s464_s10  ;;  %p707_p6 = scmp.eq.s32.totalorder %s513_s13, 1 }
  0x2a   : > { %s576_s7 = scalar_select %p705_p1, %s468_s11, %s26_s24  }
  0x2b   : > { %p584_p8 = por %p707_p6, %p706_p4  ;;  %p308_p9 = scmp.lt.s32.totalorder %s472_s12, 2 }
  0x2c   : > { %s121_s14 = sand.u32 1, %s468_s11   ;;  %p709_p12 = pmov %p706_p4 }
  0x2d   : > { %s277_s18 = sshll.u32 %s121_s14, 3  ;;  %s278_s21 = sshll.u32 %s472_s12, 7 }
  0x2e   : > { %p35_p13 = por %p34_p2, %p709_p12  ;;  %s597_s19 = scalar_lea.hbm %s694_s0, %s278_s21 }
  0x2f   : > { %s125_s23 = scalar_lea.vmem [#allocation2], %s277_s18  ;;  %s122_s27 = scalar_lea.sflag [#allocation3], %s121_s14 }
  0x30   : > { %s132_s24 = sshll.u32 %s125_s23, 4  ;;  %p599_p11 = pnand %p308_p9, %p35_p13  ;;  %s603_s24 = int_to_ptr.vmem [resolvable:$true] %s132_s24 }
  0x31   : > { %s372_s28 = scalar_lea.hbm %s597_s19, 128  ;;  %s377_s3 = scalar_lea.hbm %s694_s0, 256 }
  0x32   : > { %p373_p0 = scmp.ne.s32.totalorder %s597_s19, %s372_s28  ;;  %p374_p3 = pneg %p599_p11 }
  0x33   : > { %p378_p10 = scmp.lt.u32.totalorder %s597_s19, %s694_s0  ;;  %p379_p1 = scmp.lt.u32.totalorder %s377_s3, %s372_s28 }
  0x34   : > { %p375_p5 = pnand %p374_p3, %p373_p0  ;;  %p381_p4 = scmp.lt.u32.totalorder %s372_s28, %s597_s19 }
  0x35   : > { %p380_p2 = por %p379_p1, %p378_p10 }
  0x36   : > { %p376_p7 = pneg %p375_p5 }
  0x37   : > { %p382_p6 = por %p381_p4, %p380_p2 }
  0x39   : > { %p383_p9 = pnand %p382_p6, %p376_p7 }
  0x3b   : > { %386 = shalt.err (!%p383_p9)
}
  0x3c   : > { %s387_s6 = scalar_lea.vmem %s603_s24, 128  ;;  %s475_s14 = smov [#allocation2]  }
  0x3d   : > { %p388_p12 = scmp.ne.s32.totalorder %s603_s24, %s387_s6  ;;  %s392_s18 = sshll.u32 %s475_s14, 4  ;;  %s393_s18 = int_to_ptr.vmem [resolvable:$false] %s392_s18 }
  0x3e   : > { %s394_s21 = scalar_lea.vmem %s393_s18, 256  ;;  %p395_p5 = scmp.lt.s32.totalorder %s603_s24, %s393_s18 }
  0x3f   : > { %p390_p13 = pnand %p388_p12, %p374_p3  ;;  %p396_p10 = scmp.lt.s32.totalorder %s394_s21, %s387_s6 }
  0x41   : > { %p391_p0 = pneg %p390_p13  ;;  %p397_p1 = por %p396_p10, %p395_p5 }
  0x43   : > { %p398_p2 = pnand %p397_p1, %p391_p0 }
  0x45   : > { %401 = shalt.err (!%p398_p2)
}
  0x46   : > { %302 = dma.hbm_to_vmem [thread:$0]  (!%p599_p11), %s597_s19, 128, %s603_s24, %s122_s27  }
  0x47   : > { %p711_p7 = scmp.ne.s32.totalorder %s702_s17, 0 }
  0x48   : > { %s633_s22 = sand.u32 (!%p711_p7), 1, %s464_s10   ;;  %p712_p3 = scmp.ne.s32.totalorder (!%p711_p7), %s700_s15, 0 }
  0x49   : > { %141 = sbr.rel (%p711_p7) target bundleno = 109 (0x6d), region = 28  ;;  %s280_s25 = sshll.u32 (!%p711_p7), %s633_s22, 3 }
  0x4a   : > { %s144_s23 = scalar_lea.sflag (!%p711_p7), [#allocation3], %s633_s22  ;;  %s147_s28 = scalar_lea.vmem (!%p711_p7), [#allocation2], %s280_s25 }
  0x50   : > { %447 = dma.done.wait (%p712_p3), %s144_s23, 128  }
  0x51   : > { %449 = vsyncadd (%p712_p3), %s144_s23, 4294967168  ;;  %p713_p4 = scmp.eq.s32.totalorder %s513_s13, 0 }
  0x53   : > { %451 = dma.done.wait (%p713_p4), [#allocation6], 128   ;;  %p714_p11 = pmov %p713_p4 }
  0x54   : > { %s282_s17 = sshll.u32 %s633_s22, 2  ;;  %v172_v0 = vld [vmem:[%s147_s28] sm:$0xff]  ;;  %v174_v1 = vld [vmem:[#allocation5] sm:$0xff]  ;;  %s284_s26 = sshll.u32 %s513_s13, 6  ;;  %vm177_vm0 = vcmask 257024  }
  0x55   : > { %453 = vsyncadd (%p714_p11), [#allocation6], 4294967168  ;;  %v173_v2 = vmul.f32 5.656854, %v172_v0  ;;  %s171_s19 = scalar_lea.vmem [#allocation7], %s282_s17  ;;  %s652_s29 = scalar_lea.hbm %s696_s2, %s284_s26 }
  0x56   : > { %s193_s24 = sshll.u32 %s171_s19, 4  ;;  %s180_s30 = scalar_lea.sflag [#allocation4], %s633_s22  ;;  %s647_s24 = int_to_ptr.vmem [resolvable:$true] %s193_s24 }
  0x57   : > { %v175_v3 = vadd.f32 %v174_v1, %v173_v2  ;;  %s402_s3 = scalar_lea.vmem %s647_s24, 64  ;;  %s476_s13 = smov [#allocation7]  }
  0x58   : > { %p403_p6 = scmp.ne.s32.totalorder %s647_s24, %s402_s3  ;;  %s406_s4 = sshll.u32 %s476_s13, 4  ;;  %s407_s4 = int_to_ptr.vmem [resolvable:$false] %s406_s4 }
  0x59   : > { %v176_v4 = vpack.c.bf16 %v175_v3, %v175_v3  ;;  %s408_s5 = scalar_lea.vmem %s407_s4, 128  ;;  %p409_p13 = scmp.lt.s32.totalorder %s647_s24, %s407_s4 }
  0x5a   : > { %p404_p9 = pnand %p403_p6, %p584_p8  ;;  %p410_p0 = scmp.lt.s32.totalorder %s408_s5, %s402_s3 }
  0x5b   : > { %178 = vst.msk [vmem:[%s171_s19] sm:$0xf] %vm177_vm0, %v176_v4 }
  0x5c   : > { %p405_p12 = pneg %p404_p9  ;;  %p411_p5 = por %p410_p0, %p409_p13 }
  0x5e   : > { %p412_p10 = pnand %p411_p5, %p405_p12 }
  0x60   : > { %415 = shalt.err (!%p412_p10)
}
  0x61   : > { %s416_s6 = scalar_lea.hbm %s652_s29, 64  ;;  %s420_s21 = scalar_lea.hbm %s696_s2, 128 }
  0x62   : > { %p417_p1 = scmp.ne.s32.totalorder %s652_s29, %s416_s6  ;;  %p421_p3 = scmp.lt.u32.totalorder %s652_s29, %s696_s2 }
  0x63   : > { %p422_p4 = scmp.lt.u32.totalorder %s420_s21, %s416_s6  ;;  %p424_p6 = scmp.lt.u32.totalorder %s416_s6, %s652_s29 }
  0x64   : > { %p418_p2 = pnand %p417_p1, %p584_p8 }
  0x65   : > { %p423_p11 = por %p422_p4, %p421_p3 }
  0x66   : > { %p419_p7 = pneg %p418_p2 }
  0x67   : > { %p425_p9 = por %p424_p6, %p423_p11 }
  0x69   : > { %p426_p12 = pnand %p425_p9, %p419_p7 }
  0x6b   : > { %429 = shalt.err (!%p426_p12)
}
  0x6c   : > { %293 = dma.vmem_to_hbm [thread:$0]  (%p584_p8), %s647_s24, 64, %s652_s29, %s180_s30  }
  0x6d PF: > { %s205_s23 = sand.u32 1, %s460_s9   ;;  %p715_p13 = scmp.ne.s32.totalorder %s701_s16, 0 }
  0x6e   : > { %p716_p0 = scmp.ge.s32.totalorder %s472_s12, 2  ;;  %s206_s28 = scalar_lea.sflag [#allocation4], %s205_s23 }
  0x70   : > { %p304_p5 = pnand %p716_p0, %p715_p13 }
  0x72   : > { %455 = dma.done.wait (!%p304_p5), %s206_s28, 64  }
  0x73   : > { %457 = vsyncadd (!%p304_p5), %s206_s28, 4294967232  ;;  %p16_p10 = scmp.ge.s32.totalorder %s540_s20, 4   ;;  %s717_s9 = smov %s464_s10 }
  0x74   : > { %s718_s10 = smov %s468_s11  ;;  %s719_s11 = smov %s576_s7 }
  0x75   : > { %s720_s12 = smov %s540_s20  ;;  %18 = sbr.rel (!%p16_p10) target bundleno = 6 (0x6), region = 77 }
  0x7c   :  { %211 = vsyncpa [#allocation3], 1 }
  0x7d   :  { %213 = vsyncpa [#allocation3 + $0x1], 1 }
  0x7e   :  { %214 = vsyncpa [#allocation6], 1 }
  0x7f   :  { %215 = vsyncpa [#allocation4], 1 }
  0x80   :  { %217 = vsyncpa [#allocation4 + $0x1], 1 }

</bundles_post_ra>
